<compile_context>
chip_gen: v7x
topology: tpu7x:2x2x1
jax: 0.10.0
libtpu: 0.0.40
codegen_flags: <defaults>
</compile_context>

<pallas_src>
from functools import partial

import numpy as np
import jax
import jax.numpy as jnp
from jax.experimental import pallas as pl
from jax.experimental.pallas import tpu as pltpu


def _round_up(x, m):
    return (x + m - 1) // m * m


# ----------------------------- Pallas kernel ------------------------------

def _textcnn_fused_kernel(emb_ref, wconv_ref, bconv_ref, mask_ref, wfc_ref,
                          bfc_ref, out_ref, *, kmax, lout):
    """Fused textCNN forward for one batch tile.

    emb_ref  : (TB, Lp, D)    f32, Lp = L + (kmax - kmin), zero padded at the end
    wconv_ref: (kmax*D, Npad) f32, all branches' conv weights, zero padded
    bconv_ref: (1, Npad)      f32
    mask_ref : (lout, Npad)   f32, 1.0 where the position is valid for that lane's branch
    wfc_ref  : (Npad, Cpad)   f32
    bfc_ref  : (1, Cpad)      f32
    out_ref  : (TB, Cpad)     f32
    """
    emb = emb_ref[...]                                           # (TB, Lp, D)
    D = emb.shape[-1]

    # im2col over the kmax taps: one window tensor shared by all branches.
    windows = jnp.concatenate(
        [emb[:, j:j + lout, :] for j in range(kmax)], axis=-1)   # (TB, lout, kmax*D)

    # ONE MXU contraction for every branch & tap (zero-padded weights add 0).
    s = jnp.einsum('blc,cn->bln', windows, wconv_ref[...],
                   preferred_element_type=jnp.float32)           # (TB, lout, Npad)
    s = jnp.maximum(s + bconv_ref[...][None, :, :], 0.0)         # + bias, ReLU
    # Zero out positions beyond each branch's own Lout; post-ReLU values are
    # >= 0 so multiplying invalid positions by 0 cannot change the max.
    s = s * mask_ref[...][None, :, :]
    feats = jnp.max(s, axis=1)                                   # (TB, Npad) global max pool

    # Dropout(p=0.5) is identity at inference; fc fused here, lane-dense output.
    out_ref[...] = (jnp.dot(feats, wfc_ref[...],
                            preferred_element_type=jnp.float32)
                    + bfc_ref[...])


# ------------------------------ JAX wrapper --------------------------------

def textcnn_forward(tokens, params, kernel_sizes, *, batch_tile=128):
    # Embedding gather stays in plain JAX (random-access gather = glue).
    # TODO(synk): nn.Embedding max_norm renormalization not applied (max_norm=None here).
    emb = params['embedding'][tokens].astype(jnp.float32)        # (B, L, D)
    B, L, D = emb.shape

    ks = tuple(kernel_sizes)
    kmin, kmax = min(ks), max(ks)
    if L < kmax:
        raise ValueError(f"seq_len={L} must be >= max kernel size {kmax}")
    lout = L - kmin + 1                                          # positions for the narrowest kernel
    K = params[f'conv{ks[0]}_w'].shape[1]                        # kernel_num
    n_feat = len(ks) * K
    class_num = params['fc_w'].shape[1]

    # Lane-dense padded feature / class dims (kernel intermediates & output >= 128 wide).
    n_pad = _round_up(n_feat, 128)
    c_pad = _round_up(class_num, 128)
    kd = kmax * D

    # Pack every branch into one zero-padded conv weight / bias + validity mask.
    wconv = jnp.zeros((kd, n_pad), jnp.float32)
    bconv = jnp.zeros((1, n_pad), jnp.float32)
    mask = np.zeros((lout, n_pad), np.float32)
    for i, k in enumerate(ks):
        wconv = wconv.at[:k * D, i * K:(i + 1) * K].set(params[f'conv{k}_w'])
        bconv = bconv.at[:, i * K:(i + 1) * K].set(params[f'conv{k}_b'])
        mask[:L - k + 1, i * K:(i + 1) * K] = 1.0                # this branch's valid positions
    mask = jnp.asarray(mask)

    wfc = jnp.zeros((n_pad, c_pad), jnp.float32).at[:n_feat, :class_num].set(params['fc_w'])
    bfc = jnp.zeros((1, c_pad), jnp.float32).at[:, :class_num].set(params['fc_b'])

    # Pad the sequence so every position 0..lout-1 can read kmax taps.
    lp = L + (kmax - kmin)
    emb = jnp.pad(emb, ((0, 0), (0, lp - L), (0, 0)))

    # Batch tiling: single tile if B is small, otherwise 8-aligned tiles so the
    # batch grid can pipeline and shard across TensorCores.
    if B <= batch_tile:
        tb = B
    else:
        tb = max(8, (batch_tile // 8) * 8)
    bp = _round_up(B, tb)
    if bp != B:
        emb = jnp.pad(emb, ((0, bp - B), (0, 0), (0, 0)))
    grid = (bp // tb,)

    out = pl.pallas_call(
        partial(_textcnn_fused_kernel, kmax=kmax, lout=lout),
        out_shape=jax.ShapeDtypeStruct((bp, c_pad), jnp.float32),
        grid_spec=pltpu.PrefetchScalarGridSpec(
            num_scalar_prefetch=0,
            grid=grid,
            in_specs=[
                pl.BlockSpec((tb, lp, D), lambda b: (b, 0, 0)),   # emb batch tile
                pl.BlockSpec((kd, n_pad), lambda b: (0, 0)),      # packed conv weight
                pl.BlockSpec((1, n_pad), lambda b: (0, 0)),       # packed conv bias
                pl.BlockSpec((lout, n_pad), lambda b: (0, 0)),    # position mask
                pl.BlockSpec((n_pad, c_pad), lambda b: (0, 0)),   # fc weight
                pl.BlockSpec((1, c_pad), lambda b: (0, 0)),       # fc bias
            ],
            out_specs=pl.BlockSpec((tb, c_pad), lambda b: (b, 0)),
        ),
        compiler_params=pltpu.CompilerParams(
            dimension_semantics=("parallel",),                    # batch tiles shard across TCs (v7x)
            vmem_limit_bytes=64 * 1024 * 1024,
        ),
    )(emb, wconv, bconv, mask, wfc, bfc)

    return out[:B, :class_num]


# --------------------------- pure-JAX reference -----------------------------

def textcnn_reference(tokens, params, kernel_sizes):
    emb = params['embedding'][tokens]                            # (B, L, D)
    B, L, D = emb.shape
    feats = []
    for k in kernel_sizes:
        w = params[f'conv{k}_w']                                 # (k*D, K)
        b = params[f'conv{k}_b']                                 # (1, K)
        Lout = L - k + 1
        windows = jnp.stack([emb[:, t:t + k, :].reshape(B, k * D)
                             for t in range(Lout)], axis=1)      # (B, Lout, k*D)
        s = windows @ w + b[None, :, :]                          # (B, Lout, K)
        s = jnp.maximum(s, 0.0)
        feats.append(jnp.max(s, axis=1))                         # (B, K)
    x = jnp.concatenate(feats, axis=1)
    return x @ params['fc_w'] + params['fc_b']


# ---------------------------------- main -------------------------------------

if __name__ == "__main__":
    # Hyper-params implied by the module's __init__ (small synthetic config).
    embed_num = 50          # vocab size v
    embed_dim = 32          # dim
    kernel_num = 8          # k_dim
    kernel_sizes = (3, 4, 5)
    class_num = 4
    B, L = 2, 16

    key = jax.random.PRNGKey(0)
    keys = jax.random.split(key, 3 + 2 * len(kernel_sizes) + 2)

    params = {}
    params['embedding'] = 0.1 * jax.random.normal(
        keys[0], (embed_num, embed_dim), dtype=jnp.float32)

    for i, k in enumerate(kernel_sizes):
        # PyTorch Conv2d weight shape (K, 1, k, D) -> flatten to (K, k*D) -> T -> (k*D, K)
        w4 = 0.1 * jax.random.normal(
            keys[1 + 2 * i], (kernel_num, 1, k, embed_dim), dtype=jnp.float32)
        params[f'conv{k}_w'] = jnp.transpose(w4.reshape(kernel_num, k * embed_dim))
        params[f'conv{k}_b'] = 0.1 * jax.random.normal(
            keys[2 + 2 * i], (1, kernel_num), dtype=jnp.float32)

    feat_dim = len(kernel_sizes) * kernel_num
    # PyTorch Linear weight is (class_num, feat_dim); store transposed (feat_dim, class_num).
    params['fc_w'] = 0.1 * jax.random.normal(
        keys[-2], (feat_dim, class_num), dtype=jnp.float32)
    params['fc_b'] = 0.1 * jax.random.normal(
        keys[-1], (1, class_num), dtype=jnp.float32)

    tokens = jax.random.randint(jax.random.PRNGKey(42), (B, L), 0, embed_num,
                                dtype=jnp.int32)

    logits = textcnn_forward(tokens, params, kernel_sizes)
    logits = jax.block_until_ready(logits)

    ref = textcnn_reference(tokens, params, kernel_sizes)
    np.testing.assert_allclose(np.asarray(logits), np.asarray(ref),
                               rtol=1e-5, atol=1e-5)
    assert logits.shape == (B, class_num)
    print("KERNEL_OK")
</pallas_src>

<mosaic_0001>
module attributes {stable_mosaic.version = 11 : i64} {
  func.func @_textcnn_fused_kernel(%arg0: i32, %arg1: memref<2x18x32xf32, #tpu.memory_space<vmem>>, %arg2: memref<160x128xf32, #tpu.memory_space<vmem>>, %arg3: memref<1x128xf32, #tpu.memory_space<vmem>>, %arg4: memref<14x128xf32, #tpu.memory_space<vmem>>, %arg5: memref<128x128xf32, #tpu.memory_space<vmem>>, %arg6: memref<1x128xf32, #tpu.memory_space<vmem>>, %arg7: memref<2x128xf32, #tpu.memory_space<vmem>>) attributes {dimension_semantics = [#tpu.dimension_semantics<parallel>], iteration_bounds = array<i64: 1>, scalar_prefetch = 0 : i64, scratch_operands = 0 : i64, tpu.core_type = #tpu.core_type<tc>, window_params = [{transform_indices = @transform_0, window_bounds = array<i64: 2, 18, 32>}, {pipeline_mode = #tpu.pipeline_mode<synchronous>, transform_indices = @transform_1, window_bounds = array<i64: 160, 128>}, {pipeline_mode = #tpu.pipeline_mode<synchronous>, transform_indices = @transform_2, window_bounds = array<i64: 1, 128>}, {pipeline_mode = #tpu.pipeline_mode<synchronous>, transform_indices = @transform_3, window_bounds = array<i64: 14, 128>}, {pipeline_mode = #tpu.pipeline_mode<synchronous>, transform_indices = @transform_4, window_bounds = array<i64: 128, 128>}, {pipeline_mode = #tpu.pipeline_mode<synchronous>, transform_indices = @transform_5, window_bounds = array<i64: 1, 128>}, {transform_indices = @transform_6, window_bounds = array<i64: 2, 128>}]} {
    %c0 = arith.constant 0 : index
    %c0_0 = arith.constant 0 : index
    %c0_1 = arith.constant 0 : index
    %0 = vector.load %arg1[%c0, %c0_0, %c0_1] : memref<2x18x32xf32, #tpu.memory_space<vmem>>, vector<2x18x32xf32>
    %1 = vector.extract_strided_slice %0 {offsets = [0, 0, 0], sizes = [2, 14, 32], strides = [1, 1, 1]} : vector<2x18x32xf32> to vector<2x14x32xf32>
    %2 = vector.extract_strided_slice %0 {offsets = [0, 1, 0], sizes = [2, 14, 32], strides = [1, 1, 1]} : vector<2x18x32xf32> to vector<2x14x32xf32>
    %3 = vector.extract_strided_slice %0 {offsets = [0, 2, 0], sizes = [2, 14, 32], strides = [1, 1, 1]} : vector<2x18x32xf32> to vector<2x14x32xf32>
    %4 = vector.extract_strided_slice %0 {offsets = [0, 3, 0], sizes = [2, 14, 32], strides = [1, 1, 1]} : vector<2x18x32xf32> to vector<2x14x32xf32>
    %5 = vector.extract_strided_slice %0 {offsets = [0, 4, 0], sizes = [2, 14, 32], strides = [1, 1, 1]} : vector<2x18x32xf32> to vector<2x14x32xf32>
    %6 = tpu.concatenate %1, %2, %3, %4, %5 in 2 : vector<2x14x32xf32>, vector<2x14x32xf32>, vector<2x14x32xf32>, vector<2x14x32xf32>, vector<2x14x32xf32> -> vector<2x14x160xf32>
    %c0_2 = arith.constant 0 : index
    %c0_3 = arith.constant 0 : index
    %7 = vector.load %arg2[%c0_2, %c0_3] : memref<160x128xf32, #tpu.memory_space<vmem>>, vector<160x128xf32>
    "tpu.trace_start"() <{level = 10 : i32, message = "blc,cn->bln"}> : () -> ()
    %cst = arith.constant dense<0.000000e+00> : vector<2x14x128xf32>
    %8 = tpu.matmul %6, %7, %cst {dimension_numbers = #tpu.dot_dimension_numbers<[2], [0], [0, 1], [1], [0, 0, 0, 1, 1, 1], [], []>} : vector<2x14x160xf32>, vector<160x128xf32>, vector<2x14x128xf32> -> vector<2x14x128xf32>
    "tpu.trace_stop"() : () -> ()
    %c0_4 = arith.constant 0 : index
    %c0_5 = arith.constant 0 : index
    %9 = vector.load %arg3[%c0_4, %c0_5] : memref<1x128xf32, #tpu.memory_space<vmem>>, vector<1x128xf32>
    %10 = vector.shape_cast %9 : vector<1x128xf32> to vector<1x1x128xf32>
    %11 = vector.broadcast %10 : vector<1x1x128xf32> to vector<2x14x128xf32>
    %12 = arith.addf %8, %11 : vector<2x14x128xf32>
    %cst_6 = arith.constant 0.000000e+00 : f32
    %13 = vector.broadcast %cst_6 : f32 to vector<2x14x128xf32>
    %14 = arith.maximumf %12, %13 : vector<2x14x128xf32>
    %c0_7 = arith.constant 0 : index
    %c0_8 = arith.constant 0 : index
    %15 = vector.load %arg4[%c0_7, %c0_8] : memref<14x128xf32, #tpu.memory_space<vmem>>, vector<14x128xf32>
    %16 = vector.shape_cast %15 : vector<14x128xf32> to vector<1x14x128xf32>
    %17 = vector.broadcast %16 : vector<1x14x128xf32> to vector<2x14x128xf32>
    %18 = arith.mulf %14, %17 : vector<2x14x128xf32>
    %cst_9 = arith.constant dense<0xFF800000> : vector<2x128xf32>
    %19 = vector.multi_reduction <maximumf>, %18, %cst_9 [1] : vector<2x14x128xf32> to vector<2x128xf32>
    %c0_10 = arith.constant 0 : index
    %c0_11 = arith.constant 0 : index
    %20 = vector.load %arg5[%c0_10, %c0_11] : memref<128x128xf32, #tpu.memory_space<vmem>>, vector<128x128xf32>
    %cst_12 = arith.constant dense<0.000000e+00> : vector<2x128xf32>
    %21 = tpu.matmul %19, %20, %cst_12 {dimension_numbers = #tpu.dot_dimension_numbers<[1], [0], [0], [1], [0, 0, 1, 1], [], []>} : vector<2x128xf32>, vector<128x128xf32>, vector<2x128xf32> -> vector<2x128xf32>
    %c0_13 = arith.constant 0 : index
    %c0_14 = arith.constant 0 : index
    %22 = vector.load %arg6[%c0_13, %c0_14] : memref<1x128xf32, #tpu.memory_space<vmem>>, vector<1x128xf32>
    %23 = vector.broadcast %22 : vector<1x128xf32> to vector<2x128xf32>
    %24 = arith.addf %21, %23 : vector<2x128xf32>
    %c0_15 = arith.constant 0 : index
    %c0_16 = arith.constant 0 : index
    %25 = vector.load %arg7[%c0_15, %c0_16] : memref<2x128xf32, #tpu.memory_space<vmem>>, vector<2x128xf32>
    tpu.vector_store %arg7[%c0_15, %c0_16], %24 {strides = array<i32>} : memref<2x128xf32, #tpu.memory_space<vmem>>, vector<2x128xf32>,
    return
  }
  func.func @transform_0(%arg0: i32) -> (i32, i32, i32) {
    %c0_i32 = arith.constant 0 : i32
    %c0_i32_0 = arith.constant 0 : i32
    %c0_i32_1 = arith.constant 0 : i32
    return %arg0, %c0_i32, %c0_i32_0 : i32, i32, i32
  }
  func.func @transform_1(%arg0: i32) -> (i32, i32) {
    %c0_i32 = arith.constant 0 : i32
    %c0_i32_0 = arith.constant 0 : i32
    %c0_i32_1 = arith.constant 0 : i32
    return %c0_i32, %c0_i32_0 : i32, i32
  }
  func.func @transform_2(%arg0: i32) -> (i32, i32) {
    %c0_i32 = arith.constant 0 : i32
    %c0_i32_0 = arith.constant 0 : i32
    %c0_i32_1 = arith.constant 0 : i32
    return %c0_i32, %c0_i32_0 : i32, i32
  }
  func.func @transform_3(%arg0: i32) -> (i32, i32) {
    %c0_i32 = arith.constant 0 : i32
    %c0_i32_0 = arith.constant 0 : i32
    %c0_i32_1 = arith.constant 0 : i32
    return %c0_i32, %c0_i32_0 : i32, i32
  }
  func.func @transform_4(%arg0: i32) -> (i32, i32) {
    %c0_i32 = arith.constant 0 : i32
    %c0_i32_0 = arith.constant 0 : i32
    %c0_i32_1 = arith.constant 0 : i32
    return %c0_i32, %c0_i32_0 : i32, i32
  }
  func.func @transform_5(%arg0: i32) -> (i32, i32) {
    %c0_i32 = arith.constant 0 : i32
    %c0_i32_0 = arith.constant 0 : i32
    %c0_i32_1 = arith.constant 0 : i32
    return %c0_i32, %c0_i32_0 : i32, i32
  }
  func.func @transform_6(%arg0: i32) -> (i32, i32) {
    %c0_i32 = arith.constant 0 : i32
    %c0_i32_0 = arith.constant 0 : i32
    return %arg0, %c0_i32 : i32, i32
  }
}

</mosaic_0001>

<bundles_post_ra>
// kernel: tpu_custom_call.1
= control target key start
LH: loop header
LB: loop body
LE: loop exit
PB: predicated region body
PF: predicated region fallthrough
CT: control target
= control target key end

     0   :  { %11 = vsyncpa [#allocation3], 0  ;;  %s1484_s0 = inlined_call_operand.hbm [shape: f32[2,18,32], index: 0, kind: input, shape index: {}]   ;;  %s1485_s1 = inlined_call_operand.hbm [shape: f32[160,128], index: 1, kind: input, shape index: {}]   ;;  %s1486_s2 = inlined_call_operand.hbm [shape: f32[1,128], index: 2, kind: input, shape index: {}]   ;;  %s1487_s3 = inlined_call_operand.hbm [shape: f32[14,128], index: 3, kind: input, shape index: {}]   ;;  %s1488_s4 = inlined_call_operand.hbm [shape: f32[128,128], index: 4, kind: input, shape index: {}]   ;;  %s1489_s5 = inlined_call_operand.hbm [shape: f32[1,128], index: 5, kind: input, shape index: {}]   ;;  %s1490_s6 = inlined_call_operand.hbm [shape: f32[2,128], index: 6, kind: output, shape index: {}]  }
   0x1   :  { %12 = vsyncpa [#allocation6], 0 }
   0x2   :  { %13 = vsyncpa [#allocation9], 0 }
   0x3   :  { %14 = vsyncpa [#allocation12], 0 }
   0x4   :  { %15 = vsyncpa [#allocation4], 0  ;;  %s1185_s21 = smov [#allocation5]   ;;  %s1186_s23 = smov [#allocation8]  }
   0x5   :  { %s33_s22 = sshll.u32 %s1185_s21, 4  ;;  %s55_s24 = sshll.u32 %s1186_s23, 4  ;;  %s34_s22 = int_to_ptr.vmem [resolvable:$true] %s33_s22  ;;  %s1236_s24 = int_to_ptr.vmem [resolvable:$true] %s55_s24 }
   0x6   :  { %s1021_s27 = scalar_lea.hbm %s1485_s1, 2560 }
   0x7   :  { %p1022_p0 = scmp.ne.s32.totalorder %s1485_s1, %s1021_s27  ;;  %p1025_p1 = scmp.lt.u32.totalorder %s1021_s27, %s1485_s1 }
   0x9   :  { %p1027_p2 = pnand %p1025_p1, %p1022_p0 }
   0xb   :  { %1030 = shalt.err (!%p1027_p2)
}
   0xc   :  { %s1031_s8 = scalar_lea.vmem %s34_s22, 2560  ;;  %p1036_p4 = scmp.lt.s32.totalorder %s34_s22, %s34_s22 }
   0xd   :  { %p1032_p3 = scmp.ne.s32.totalorder %s34_s22, %s1031_s8  ;;  %p1037_p5 = scmp.lt.s32.totalorder %s1031_s8, %s1031_s8 }
   0xf   :  { %p1038_p6 = por %p1037_p5, %p1036_p4 }
  0x11   :  { %p1039_p7 = pnand %p1038_p6, %p1032_p3 }
  0x13   :  { %1042 = shalt.err (!%p1039_p7)
}
  0x14   :  { %s1187_s9 = smov 128   ;;  %s1188_s10 = smov 8  }
  0x15   :  { %39 = dma.hbm_to_vmem [thread:$0]  %s1485_s1, 2560, %s34_s22, [#allocation6], %s1187_s9, %s1187_s9, %s1188_s10  }
  0x16   :  { %s1043_s15 = scalar_lea.hbm %s1487_s3, 256 }
  0x17   :  { %p1044_p8 = scmp.ne.s32.totalorder %s1487_s3, %s1043_s15  ;;  %p1047_p9 = scmp.lt.u32.totalorder %s1043_s15, %s1487_s3 }
  0x19   :  { %p1049_p10 = pnand %p1047_p9, %p1044_p8 }
  0x1b   :  { %1052 = shalt.err (!%p1049_p10)
}
  0x1c   :  { %s1053_s20 = scalar_lea.vmem %s1236_s24, 256  ;;  %p1058_p12 = scmp.lt.s32.totalorder %s1236_s24, %s1236_s24 }
  0x1d   :  { %p1054_p11 = scmp.ne.s32.totalorder %s1236_s24, %s1053_s20  ;;  %p1059_p13 = scmp.lt.s32.totalorder %s1053_s20, %s1053_s20 }
  0x1f   :  { %p1060_p0 = por %p1059_p13, %p1058_p12 }
  0x21   :  { %p1061_p1 = pnand %p1060_p0, %p1054_p11 }
  0x23   :  { %1064 = shalt.err (!%p1061_p1)
}
  0x24   :  { %61 = dma.hbm_to_vmem [thread:$0]  %s1487_s3, 256, %s1236_s24, [#allocation9], %s1187_s9, %s1187_s9, %s1188_s10  }
  0x25   :  { %s1189_s22 = smov [#allocation2]   ;;  %s1190_s25 = smov [#allocation7]  }
  0x26   :  { %s21_s23 = sshll.u32 %s1189_s22, 4  ;;  %s46_s26 = sshll.u32 %s1190_s25, 4  ;;  %s22_s23 = int_to_ptr.vmem [resolvable:$true] %s21_s23  ;;  %s47_s26 = int_to_ptr.vmem [resolvable:$true] %s46_s26 }
  0x27   :  { %s1065_s29 = scalar_lea.hbm %s1484_s0, 768 }
  0x28   :  { %p1066_p2 = scmp.ne.s32.totalorder %s1484_s0, %s1065_s29  ;;  %p1069_p3 = scmp.lt.u32.totalorder %s1065_s29, %s1484_s0 }
  0x2a   :  { %p1071_p4 = pnand %p1069_p3, %p1066_p2 }
  0x2c   :  { %1074 = shalt.err (!%p1071_p4)
}
  0x2d   :  { %s1075_s3 = scalar_lea.vmem %s22_s23, 768  ;;  %p1080_p6 = scmp.lt.s32.totalorder %s22_s23, %s22_s23 }
  0x2e   :  { %p1076_p5 = scmp.ne.s32.totalorder %s22_s23, %s1075_s3  ;;  %p1081_p7 = scmp.lt.s32.totalorder %s1075_s3, %s1075_s3 }
  0x30   :  { %p1082_p8 = por %p1081_p7, %p1080_p6 }
  0x32   :  { %p1083_p9 = pnand %p1082_p8, %p1076_p5 }
  0x34   :  { %1086 = shalt.err (!%p1083_p9)
}
  0x35   :  { %27 = dma.hbm_to_vmem [thread:$0]  %s1484_s0, 768, %s22_s23, [#allocation3], %s1187_s9, %s1187_s9, %s1188_s10  }
  0x36   :  { %s1087_s15 = scalar_lea.hbm %s1486_s2, 16 }
  0x37   :  { %p1088_p10 = scmp.ne.s32.totalorder %s1486_s2, %s1087_s15  ;;  %p1091_p11 = scmp.lt.u32.totalorder %s1087_s15, %s1486_s2 }
  0x39   :  { %p1093_p12 = pnand %p1091_p11, %p1088_p10 }
  0x3b   :  { %1096 = shalt.err (!%p1093_p12)
}
  0x3c   :  { %s1097_s20 = scalar_lea.vmem %s47_s26, 16  ;;  %s1101_s1 = scalar_lea.vmem %s47_s26, 32 }
  0x3d   :  { %p1098_p13 = scmp.ne.s32.totalorder %s47_s26, %s1097_s20  ;;  %p1102_p0 = scmp.lt.s32.totalorder %s47_s26, %s47_s26 }
  0x3e   :  { %p1103_p1 = scmp.lt.s32.totalorder %s1101_s1, %s1097_s20 }
  0x40   :  { %p1104_p2 = por %p1103_p1, %p1102_p0 }
  0x42   :  { %p1105_p3 = pnand %p1104_p2, %p1098_p13 }
  0x44   :  { %1108 = shalt.err (!%p1105_p3)
}
  0x45   :  { %49 = dma.hbm_to_vmem [thread:$0]  %s1486_s2, 16, %s47_s26, [#allocation6]  }
  0x46   :  { %s1191_s22 = smov [#allocation10]   ;;  %s1192_s25 = smov [#allocation11]  }
  0x47   :  { %s67_s23 = sshll.u32 %s1191_s22, 4  ;;  %s80_s27 = sshll.u32 %s1192_s25, 4  ;;  %s68_s23 = int_to_ptr.vmem [resolvable:$true] %s67_s23  ;;  %s81_s27 = int_to_ptr.vmem [resolvable:$true] %s80_s27 }
  0x48   :  { %s1109_s30 = scalar_lea.hbm %s1488_s4, 2048 }
  0x49   :  { %p1110_p4 = scmp.ne.s32.totalorder %s1488_s4, %s1109_s30  ;;  %p1113_p5 = scmp.lt.u32.totalorder %s1109_s30, %s1488_s4 }
  0x4b   :  { %p1115_p6 = pnand %p1113_p5, %p1110_p4 }
  0x4d   :  { %1118 = shalt.err (!%p1115_p6)
}
  0x4e   :  { %s1119_s2 = scalar_lea.vmem %s68_s23, 2048  ;;  %p1124_p8 = scmp.lt.s32.totalorder %s68_s23, %s68_s23 }
  0x4f   :  { %p1120_p7 = scmp.ne.s32.totalorder %s68_s23, %s1119_s2  ;;  %p1125_p9 = scmp.lt.s32.totalorder %s1119_s2, %s1119_s2 }
  0x51   :  { %p1126_p10 = por %p1125_p9, %p1124_p8 }
  0x53   :  { %p1127_p11 = pnand %p1126_p10, %p1120_p7 }
  0x55   :  { %1130 = shalt.err (!%p1127_p11)
}
  0x56   :  { %73 = dma.hbm_to_vmem [thread:$0]  %s1488_s4, 2048, %s68_s23, [#allocation9], %s1187_s9, %s1187_s9, %s1188_s10  }
  0x57   :  { %s1131_s14 = scalar_lea.hbm %s1489_s5, 16 }
  0x58   :  { %p1132_p12 = scmp.ne.s32.totalorder %s1489_s5, %s1131_s14  ;;  %p1135_p13 = scmp.lt.u32.totalorder %s1131_s14, %s1489_s5 }
  0x5a   :  { %p1137_p0 = pnand %p1135_p13, %p1132_p12 }
  0x5c   :  { %1140 = shalt.err (!%p1137_p0)
}
  0x5d   :  { %s1141_s19 = scalar_lea.vmem %s81_s27, 16  ;;  %s1145_s20 = scalar_lea.vmem %s81_s27, 32 }
  0x5e   :  { %p1142_p1 = scmp.ne.s32.totalorder %s81_s27, %s1141_s19  ;;  %p1146_p2 = scmp.lt.s32.totalorder %s81_s27, %s81_s27 }
  0x5f   :  { %p1147_p3 = scmp.lt.s32.totalorder %s1145_s20, %s1141_s19 }
  0x61   :  { %p1148_p4 = por %p1147_p3, %p1146_p2 }
  0x63   :  { %p1149_p5 = pnand %p1148_p4, %p1142_p1 }
  0x65   :  { %1152 = shalt.err (!%p1149_p5)
}
  0x66   :  { %83 = dma.hbm_to_vmem [thread:$0]  %s1489_s5, 16, %s81_s27, [#allocation12]  }
  0x67   :  { %1175 = dma.done.wait [#allocation3], 768  }
  0x68   :  { %1176 = vsyncadd [#allocation3], 4294966528 }
  0x69   :  { %1177 = dma.done.wait [#allocation6], 2576  }
  0x6a   :  { %1178 = vsyncadd [#allocation6], 4294964720 }
  0x6b   :  { %1179 = dma.done.wait [#allocation9], 2304  }
  0x6c   :  { %1180 = vsyncadd [#allocation9], 4294964992 }
  0x6d   :  { %1181 = dma.done.wait [#allocation12], 16  }
  0x6e   :  { %1182 = vsyncadd [#allocation12], 4294967280  ;;  %v1193_v0 = vmov 0.0|0.0   ;;  %v1329_v1 = vld [vmem:[#allocation2 + $0x8] sm:$0xff]  ;;  %v1331_v2 = vld [vmem:[#allocation2] sm:$0xff]  ;;  %vm152_vm0 = vcmask 1044480   ;;  %v236_v63 = vlaneseq }
  0x6f   :  { %949 = vmatprep.subr.bf16.mxu0 %v1193_v0  ;;  %979 = vmatprep.subr.bf16.mxu1 %v1193_v0  ;;  %vm112_vm1 = vcmask 1046528   ;;  %v1333_v3 = vld [vmem:[#allocation2 + $0x18] sm:$0xff]  ;;  %v133_v4 = vrot.slane %v1329_v1, 2  ;;  %v114_v5 = vrot.slane %v1329_v1, 1  ;;  %v153_v6 = vrot.slane %v1331_v2, 3  ;;  %v1339_v8 = vld [vmem:[#allocation2 + $0x20] sm:$0xff] }
  0x70   :  { %v154_v7 = vrot.slane %v1329_v1, 3  ;;  %v113_v9 = vrot.slane %v1331_v2, 1  ;;  %s1194_s5 = smov 64   ;;  %s1195_s10 = smov 32   ;;  %v116_v10 = vrot.slane %v1333_v3, 1  ;;  %v201_v11 = vld [vmem:[#allocation5] sm:$0xff] }
  0x71   :  { %140 = vrot.lane.b32.xlu0 %v133_v4, %s1194_s5  ;;  %121 = vrot.lane.b32.xlu1 %v114_v5, %s1195_s10  ;;  %v202_v12 = vld [vmem:[#allocation5 + $0x8] sm:$0xff]  ;;  %v117_v15 = vrot.slane %v1339_v8, 1  ;;  %v132_v16 = vrot.slane %v1331_v2, 2  ;;  %vm131_vm2 = vcmask 1045504   ;;  %v1349_v17 = vld [vmem:[#allocation2 + $0x10] sm:$0x3] }
  0x72   :  { %v155_v13 = vsel %vm152_vm0, %v153_v6, %v154_v7  ;;  %v115_v14 = vsel %vm112_vm1, %v113_v9, %v114_v5  ;;  %v203_v18 = vld [vmem:[#allocation5 + $0x10] sm:$0xff]  ;;  %v204_v19 = vld [vmem:[#allocation5 + $0x18] sm:$0xff]  ;;  %v950_v20 = vpack.c.bf16 %v202_v12, %v201_v11  ;;  %s1196_s1 = smov 96   ;;  %v135_v21 = vrot.slane %v1333_v3, 2  ;;  %v205_v27 = vld [vmem:[#allocation5 + $0x20] sm:$0xff]  ;;  %s1200_s0 = smov [#allocation13]  }
  0x73   :  { %v136_v22 = vrot.slane %v1339_v8, 2  ;;  %v118_v23 = vsel %vm112_vm1, %v116_v10, %v117_v15  ;;  %v134_v24 = vsel %vm131_vm2, %v132_v16, %v133_v4  ;;  %v156_v25 = vrot.slane %v1349_v17, 3  ;;  %v206_v28 = vld [vmem:[#allocation5 + $0x28] sm:$0xff]  ;;  %v1365_v34 = vld [vmem:[#allocation2 + $0x28] sm:$0x3]  ;;  %v207_v35 = vld [vmem:[#allocation5 + $0x30] sm:$0xff] }
  0x74   :  { %951 = vmatpush1.bf16.msra.mxu0 %v950_v20  ;;  %v953_v26 = vpack.c.bf16 %v204_v19, %v203_v18  ;;  %v158_v29 = vrot.slane %v1333_v3, 3  ;;  %v159_v32 = vrot.slane %v1339_v8, 3  ;;  %v956_v33 = vpack.c.bf16 %v206_v28, %v205_v27  ;;  %v208_v36 = vld [vmem:[#allocation5 + $0x38] sm:$0xff]  ;;  %v209_v40 = vld [vmem:[#allocation5 + $0x40] sm:$0xff]  ;;  %v210_v41 = vld [vmem:[#allocation5 + $0x48] sm:$0xff]  ;;  %s879_s21 = sshll.u32 %s1200_s0, 4  ;;  %s880_s21 = int_to_ptr.vmem [resolvable:$true] %s879_s21 }
  0x75   :  { %163 = vrot.lane.b32.xlu1 %v155_v13, %s1196_s1  ;;  %119 = vrot.lane.b32.xlu0 %v115_v14, %s1195_s10  ;;  %v137_v30 = vsel %vm131_vm2, %v135_v21, %v136_v22  ;;  %v157_v31 = vsel %vm152_vm0, %v154_v7, %v156_v25  ;;  %v161_v38 = vrot.slane %v1365_v34, 3  ;;  %v959_v39 = vpack.c.bf16 %v208_v36, %v207_v35  ;;  %v211_v44 = vld [vmem:[#allocation5 + $0x50] sm:$0xff]  ;;  %v212_v45 = vld [vmem:[#allocation5 + $0x58] sm:$0xff]  ;;  %v213_v47 = vld [vmem:[#allocation5 + $0x60] sm:$0xff]  ;;  %s1153_s22 = scalar_lea.vmem %s880_s21, 32  ;;  %p1158_p7 = scmp.lt.s32.totalorder %s880_s21, %s880_s21 }
  0x76   :  { %952 = vmatprep.subr.bf16.mxu0 %v1193_v0  ;;  %v160_v37 = vsel %vm152_vm0, %v158_v29, %v159_v32  ;;  %v962_v43 = vpack.c.bf16 %v210_v41, %v209_v40  ;;  %v965_v46 = vpack.c.bf16 %v212_v45, %v211_v44  ;;  %v214_v48 = vld [vmem:[#allocation5 + $0x68] sm:$0xff]  ;;  %v215_v50 = vld [vmem:[#allocation5 + $0x70] sm:$0xff]  ;;  %v216_v51 = vld [vmem:[#allocation5 + $0x78] sm:$0xff]  ;;  %v1197_v61 = vmov 1983009808   ;;  %p1154_p6 = scmp.ne.s32.totalorder %s880_s21, %s1153_s22  ;;  %p1159_p8 = scmp.lt.s32.totalorder %s1153_s22, %s1153_s22 }
  0x77   :  { %v162_v42 = vsel %vm152_vm0, %v159_v32, %v161_v38  ;;  %v968_v49 = vpack.c.bf16 %v214_v48, %v213_v47  ;;  %v971_v52 = vpack.c.bf16 %v216_v51, %v215_v50  ;;  %v217_v53 = vld [vmem:[#allocation5 + $0x80] sm:$0xff]  ;;  %v218_v54 = vld [vmem:[#allocation5 + $0x88] sm:$0xff]  ;;  %v219_v56 = vld [vmem:[#allocation5 + $0x90] sm:$0xff]  ;;  %v234_v62 = vunpack.c.l.s4 %v1197_v61 }
  0x78   :  { %954 = vmatpush1.bf16.msra.mxu0 %v953_v26  ;;  %v974_v55 = vpack.c.bf16 %v218_v54, %v217_v53  ;;  %v220_v57 = vld [vmem:[#allocation5 + $0x98] sm:$0xff]  ;;  %v176_v6 = vrot.slane %v1331_v2, 4  ;;  %v177_v7 = vrot.slane %v1329_v1, 4  ;;  %vm175_vm3 = vcmask 1043456   ;;  %p1160_p9 = por %p1159_p8, %p1158_p7 }
  0x79   :  { %123 = vrot.lane.b32.xlu1 %v118_v23, %s1195_s10  ;;  %138 = vrot.lane.b32.xlu0 %v134_v24, %s1194_s5  ;;  %v977_v58 = vpack.c.bf16 %v220_v57, %v219_v56  ;;  %v235_v9 = vunpack.c.0.s8 %v234_v62  ;;  %v237_v10 = vshrl.u32 %v236_v63, 7  ;;  %vm186_vm4 = vcmask 261120  }
  0x7a   :  { %955 = vmatprep.subr.bf16.mxu0 %v1193_v0  ;;  %vm196_vm5 = vcmask 785408   ;;  %v179_v11 = vrot.slane %v1349_v17, 4  ;;  %v178_v14 = vsel %vm175_vm3, %v176_v6, %v177_v7  ;;  %vm191_vm6 = vcmask 523264   ;;  %p1161_p10 = pnand %p1160_p9, %p1154_p6 }
  0x7b   :  { %v1392_v18 = vsub.s32 %v235_v9, %v237_v10  ;;  %v181_v21 = vrot.slane %v1333_v3, 4  ;;  %v182_v23 = vrot.slane %v1339_v8, 4  ;;  %v184_v41 = vrot.slane %v1365_v34, 4 }
  0x7c   :  { %957 = vmatpush1.bf16.msra.mxu0 %v956_v33  ;;  %vm1198_vm7 = vmmov 0   ;;  %vm799_vm8 = vcmask 1041409  }
  0x7d   :  { %142 = vrot.lane.b32.xlu1 %v137_v30, %s1194_s5  ;;  %165 = vrot.lane.b32.xlu0 %v157_v31, %s1196_s1  ;;  %v183_v31 = vsel %vm175_vm3, %v181_v21, %v182_v23  ;;  %v185_v54 = vsel %vm175_vm3, %v182_v23, %v184_v41  ;;  %v776_v23 = vld [vmem:[#allocation10 + $0x10] sm:$0xff] }
  0x7e   :  { %958 = vmatprep.subr.bf16.mxu0 %v1193_v0 }
  0x80   :  { %960 = vmatpush1.bf16.msra.mxu0 %v959_v39 }
  0x81   :  { %167 = vrot.lane.b32.xlu0 %v160_v37, %s1196_s1  ;;  %125 = vrot.lane.b32.xlu1 %v117_v15, %s1195_s10 }
  0x82   :  { %961 = vmatprep.subr.bf16.mxu0 %v1193_v0 }
  0x84   :  { %963 = vmatpush1.bf16.msra.mxu0 %v962_v43 }
  0x85   :  { %144 = vrot.lane.b32.xlu0 %v136_v22, %s1194_s5  ;;  %169 = vrot.lane.b32.xlu1 %v162_v42, %s1196_s1 }
  0x86   :  { %964 = vmatprep.subr.bf16.mxu0 %v1193_v0 }
  0x88   :  { %966 = vmatpush1.bf16.msra.mxu0 %v965_v46 }
  0x89   :  { %967 = vmatprep.subr.bf16.mxu0 %v1193_v0 }
  0x8c   :  { %969 = vmatpush1.bf16.msra.mxu0 %v968_v49 }
  0x8d   :  { %970 = vmatprep.subr.bf16.mxu0 %v1193_v0 }
  0x90   :  { %972 = vmatpush1.bf16.msra.mxu0 %v971_v52 }
  0x91   :  { %973 = vmatprep.subr.bf16.mxu0 %v1193_v0 }
  0x94   :  { %975 = vmatpush1.bf16.msra.mxu0 %v974_v55 }
  0x95   :  { %976 = vmatprep.subr.bf16.mxu0 %v1193_v0 }
  0x98   :  { %978 = vmatpush1.bf16.msra.mxu0 %v977_v58 }
  0xe3   :  { %v141_v59 = vpop.permute.xlu0 %140  ;;  %v122_v60 = vpop.permute.xlu1 %121 }
  0xe4   :  { %v188_v16 = vsel %vm186_vm4, %v1329_v1, %v122_v60 }
  0xe5   :  { %v193_v25 = vsel %vm191_vm6, %v188_v16, %v141_v59 }
  0xe7   :  { %v164_v4 = vpop.permute.xlu1 %163  ;;  %v120_v5 = vpop.permute.xlu0 %119 }
  0xe8   :  { %v187_v12 = vsel %vm186_vm4, %v1331_v2, %v120_v5  ;;  %v180_v2 = vsel %vm175_vm3, %v177_v7, %v179_v11 }
  0xeb   :  { %v124_v13 = vpop.permute.xlu1 %123  ;;  %v139_v15 = vpop.permute.xlu0 %138 }
  0xec   :  { %v192_v19 = vsel %vm191_vm6, %v187_v12, %v139_v15  ;;  %v189_v30 = vsel %vm186_vm4, %v1333_v3, %v124_v13 }
  0xed   :  { %v197_v20 = vsel %vm196_vm5, %v192_v19, %v164_v4 }
  0xee   :  { %v231_v17 = vcombine.low %v197_v20, %v178_v14  ;;  %v232_v22 = vcombine.high %v197_v20, %v178_v14 }
  0xef   :  { %v143_v24 = vpop.permute.xlu1 %142  ;;  %v166_v26 = vpop.permute.xlu0 %165 }
  0xf0   :  { %v239_v1 = vrot.slane %v231_v17, %v1392_v18  ;;  %v246_v27 = vrot.slane %v232_v22, %v1392_v18  ;;  %v198_v28 = vsel %vm196_vm5, %v193_v25, %v166_v26  ;;  %v194_v35 = vsel %vm191_vm6, %v189_v30, %v143_v24  ;;  %v774_v17 = vld [vmem:[#allocation10] sm:$0xff]  ;;  %v775_v22 = vld [vmem:[#allocation10 + $0x8] sm:$0xff]  ;;  %v777_v24 = vld [vmem:[#allocation10 + $0x18] sm:$0xff] }
  0xf1   :  { %v249_v29 = vcombine.low %v198_v28, %v180_v2  ;;  %v250_v36 = vcombine.high %v198_v28, %v180_v2  ;;  %v980_v2 = vpack.c.bf16 %v775_v22, %v774_v17  ;;  %v983_v25 = vpack.c.bf16 %v777_v24, %v776_v23  ;;  %v778_v26 = vld [vmem:[#allocation10 + $0x20] sm:$0xff]  ;;  %v780_v28 = vld [vmem:[#allocation10 + $0x30] sm:$0xff] }
  0xf2   :  { %v247_v32 = vcombine.high %v239_v1, %v239_v1  ;;  %v248_v33 = vcombine.high %v246_v27, %v246_v27 }
  0xf3   :  { %v257_v37 = vrot.slane %v249_v29, %v1392_v18  ;;  %v168_v38 = vpop.permute.xlu0 %167  ;;  %v126_v39 = vpop.permute.xlu1 %125  ;;  %v264_v48 = vrot.slane %v250_v36, %v1392_v18  ;;  %981 = vmatpush3.bf16.msra.mxu1 %v980_v2  ;;  %v781_v29 = vld [vmem:[#allocation10 + $0x38] sm:$0xff] }
  0xf4   :  { %v199_v40 = vsel %vm196_vm5, %v194_v35, %v168_v38  ;;  %v318_v42 = vcombine.low %v239_v1, %v247_v32  ;;  %v319_v43 = vcombine.low %v246_v27, %v248_v33  ;;  %v190_v51 = vsel %vm186_vm4, %v1339_v8, %v126_v39  ;;  %982 = vmatprep.subr.bf16.mxu1 %v1193_v0  ;;  %v779_v1 = vld [vmem:[#allocation10 + $0x28] sm:$0xff]  ;;  %v784_v35 = vld [vmem:[#allocation10 + $0x50] sm:$0xff]  ;;  %v785_v36 = vld [vmem:[#allocation10 + $0x58] sm:$0xff] }
  0xf5   :  { %v265_v44 = vcombine.high %v257_v37, %v257_v37  ;;  %v266_v45 = vcombine.low %v199_v40, %v183_v31  ;;  %v267_v3 = vcombine.high %v199_v40, %v183_v31  ;;  %v986_v27 = vpack.c.bf16 %v779_v1, %v778_v26  ;;  %v782_v31 = vld [vmem:[#allocation10 + $0x40] sm:$0xff]  ;;  %v783_v32 = vld [vmem:[#allocation10 + $0x48] sm:$0xff] }
  0xf6   :  { %v326_v46 = vrot.slane %v318_v42, %v1392_v18  ;;  %v333_v47 = vrot.slane %v319_v43, %v1392_v18  ;;  %v989_v30 = vpack.c.bf16 %v781_v29, %v780_v28  ;;  %v992_v33 = vpack.c.bf16 %v783_v32, %v782_v31  ;;  %v786_v39 = vld [vmem:[#allocation10 + $0x60] sm:$0xff]  ;;  %v787_v40 = vld [vmem:[#allocation10 + $0x68] sm:$0xff]  ;;  %v788_v42 = vld [vmem:[#allocation10 + $0x70] sm:$0xff] }
  0xf7   :  { %v336_v49 = vcombine.low %v257_v37, %v265_v44  ;;  %v274_v50 = vrot.slane %v266_v45, %v1392_v18  ;;  %v145_v52 = vpop.permute.xlu0 %144  ;;  %v170_v53 = vpop.permute.xlu1 %169  ;;  %v281_v57 = vrot.slane %v267_v3, %v1392_v18  ;;  %984 = vmatpush3.bf16.msra.mxu1 %v983_v25  ;;  %v995_v37 = vpack.c.bf16 %v785_v36, %v784_v35  ;;  %v789_v43 = vld [vmem:[#allocation10 + $0x78] sm:$0xff]  ;;  %v891_v45 = vld [vmem:[#allocation7] ss:$0 sm:$0xff] }
  0xf8   :  { %v195_v34 = vsel %vm191_vm6, %v190_v51, %v145_v52  ;;  %v335_v55 = vcombine.high %v326_v46, %v333_v47  ;;  %v334_v56 = vcombine.low %v326_v46, %v333_v47  ;;  %985 = vmatprep.subr.bf16.mxu1 %v1193_v0  ;;  %v1199_v38 = vmov 0.0  }
  0xf9   :  { %v282_v58 = vcombine.high %v274_v50, %v274_v50  ;;  %v337_v59 = vcombine.low %v264_v48, %v274_v50  ;;  %v200_v60 = vsel %vm196_vm5, %v195_v34, %v170_v53  ;;  %v344_v61 = vrot.slane %v336_v49, %v1392_v18  ;;  %946 = vmatprep.mubr.msk.f32.mxu1 %vm1198_vm7, %v1199_v38 }
  0xfa   :  { %892 = vmatprep.mubr.msk.f32.mxu0 %vm186_vm4, %v335_v55  ;;  %v284_v62 = vcombine.low %v200_v60, %v185_v54  ;;  %v285_v63 = vcombine.high %v200_v60, %v185_v54  ;;  %v283_v4 = vcombine.high %v281_v57, %v281_v57  ;;  %v998_v41 = vpack.c.bf16 %v787_v40, %v786_v39  ;;  %v616_v54 = vld [vmem:[#allocation8] sm:$0xff] }
  0xfb   :  { %v351_v8 = vrot.slane %v337_v59, %v1392_v18  ;;  %505 = vmatmul.mubr.f32.vlgmr.msra.gmra.mrb[0].mxu0 %v334_v56  ;;  %v354_v5 = vcombine.low %v282_v58, %v281_v57  ;;  %987 = vmatpush3.bf16.msra.mxu1 %v986_v27  ;;  %v1001_v44 = vpack.c.bf16 %v789_v43, %v788_v42 }
  0xfc   :  { %v292_v6 = vrot.slane %v284_v62, %v1392_v18  ;;  %v299_v10 = vrot.slane %v285_v63, %v1392_v18  ;;  %988 = vmatprep.subr.bf16.mxu1 %v1193_v0  ;;  %v301_v3 = vcombine.high %v891_v45, %v891_v45  ;;  %v308_v46 = vrot.slane %v891_v45, %v1392_v18 }
  0xfd   :  { %v353_v7 = vcombine.high %v344_v61, %v351_v8  ;;  %v352_v9 = vcombine.low %v344_v61, %v351_v8  ;;  %v362_v13 = vrot.slane %v354_v5, %v1392_v18  ;;  %v620_v56 = vcombine.high %v616_v54, %v616_v54 }
  0xfe   :  { %v300_v11 = vcombine.high %v292_v6, %v292_v6  ;;  %v355_v12 = vcombine.low %v283_v4, %v292_v6  ;;  %v315_v47 = vrot.slane %v301_v3, %v1392_v18  ;;  %v316_v48 = vcombine.high %v308_v46, %v308_v46  ;;  %v617_v4 = vld [vmem:[#allocation8 + $0x8] sm:$0x3f] }
  0xff   :  { %893 = vmatprep.mubr.msk.f32.mxu0 %vm186_vm4, %v353_v7  ;;  %990 = vmatpush3.bf16.msra.mxu1 %v989_v30  ;;  %v627_v58 = vrot.slane %v616_v54, %v1392_v18  ;;  %v1445_v62 = vrot.slane %v620_v56, %v1392_v18 }
 0x100   :  { %510 = vmatmul.mubr.f32.gmra.mrb[2].mxu0 %v352_v9  ;;  %v369_v14 = vrot.slane %v355_v12, %v1392_v18  ;;  %v372_v15 = vcombine.low %v300_v11, %v299_v10  ;;  %991 = vmatprep.subr.bf16.mxu1 %v1193_v0  ;;  %v317_v49 = vcombine.high %v315_v47, %v315_v47 }
 0x101   :  { %v385_v50 = vcombine.low %v308_v46, %v316_v48  ;;  %v402_v34 = vcombine.low %v315_v47, %v308_v46  ;;  %v411_v59 = vcombine.low %v316_v48, %v315_v47  ;;  %v635_v7 = vcombine.high %v627_v58, %v627_v58 }
 0x102   :  { %v379_v16 = vrot.slane %v372_v15, %v1392_v18  ;;  %v371_v19 = vcombine.high %v362_v13, %v369_v14  ;;  %v370_v20 = vcombine.low %v362_v13, %v369_v14  ;;  %v386_v51 = vcombine.low %v315_v47, %v317_v49 }
 0x103   :  { %993 = vmatpush3.bf16.msra.mxu1 %v992_v33  ;;  %v393_v52 = vrot.slane %v385_v50, %v1392_v18  ;;  %v412_v8 = vcombine.low %v317_v49, %v308_v46  ;;  %v419_v9 = vrot.slane %v411_v59, %v1392_v18  ;;  %v637_v13 = vcombine.high %v617_v4, %v617_v4 }
 0x104   :  { %894 = vmatprep.mubr.msk.f32.mxu0 %vm186_vm4, %v371_v19  ;;  %v380_v21 = vcombine.high %v379_v16, %v379_v16  ;;  %994 = vmatprep.subr.bf16.mxu1 %v1193_v0  ;;  %v400_v53 = vrot.slane %v386_v51, %v1392_v18  ;;  %v636_v15 = vcombine.high %v1445_v62, %v1445_v62 }
 0x105   :  { %515 = vmatmul.mubr.f32.gmra.mrb[4].mxu0 %v370_v20  ;;  %v426_v14 = vrot.slane %v412_v8, %v1392_v18  ;;  %v644_v19 = vrot.slane %v617_v4, %v1392_v18  ;;  %v651_v1 = vrot.slane %v637_v13, %v1392_v18 }
 0x106   :  { %895 = vmatprep.mubr.msk.f32.mxu0 %vm186_vm4, %v380_v21  ;;  %v401_v55 = vcombine.low %v393_v52, %v400_v53 }
 0x107   :  { %996 = vmatpush3.bf16.msra.mxu1 %v995_v37  ;;  %v427_v27 = vcombine.low %v419_v9, %v426_v14  ;;  %v652_v31 = vcombine.high %v644_v19, %v644_v19 }
 0x108   :  { %997 = vmatprep.subr.bf16.mxu1 %v1193_v0 }
 0x109   :  { %520 = vmatmul.mubr.f32.gmra.mrb[6].mxu0 %v379_v16 }
 0x10b   :  { %999 = vmatpush3.bf16.msra.mxu1 %v998_v41 }
 0x10c   :  { %1000 = vmatprep.subr.bf16.mxu1 %v1193_v0  ;;  %v409_v0 = vrot.slane %v402_v34, %v1392_v18 }
 0x10e   :  { %v410_v63 = vcombine.low %v393_v52, %v409_v0 }
 0x10f   :  { %1002 = vmatpush3.bf16.msra.mxu1 %v1001_v44 }
 0x1ce   :  { %v506_v57 = vpop.f32.mrb[0].mxu0 }
 0x1cf   :  { %v507_v60 = vadd.f32 %v506_v57, %v401_v55  ;;  %v508_v61 = vpop.f32.mrb[1].mxu0 }
 0x1d1   :  { %v529_v5 = vcombine.high %v507_v60, %v507_v60  ;;  %v536_v6 = vrot.slane %v507_v60, %v1392_v18 }
 0x1d3   :  { %v543_v10 = vrot.slane %v529_v5, %v1392_v18  ;;  %v544_v11 = vcombine.high %v536_v6, %v536_v6  ;;  %v511_v12 = vpop.f32.mrb[2].mxu0  ;;  %v602_v17 = vmax.f32 %v536_v6, 0.0 }
 0x1d4   :  { %v512_v16 = vadd.f32 %v511_v12, %v410_v63  ;;  %v513_v20 = vpop.f32.mrb[3].mxu0 }
 0x1d5   :  { %v545_v21 = vcombine.high %v543_v10, %v543_v10  ;;  %v603_v22 = vmax.f32 %v544_v11, 0.0  ;;  %v604_v2 = vmax.f32 %v543_v10, 0.0  ;;  %v660_v32 = vmul.f32 %v627_v58, %v602_v17 }
 0x1d6   :  { %v546_v23 = vcombine.high %v512_v16, %v512_v16  ;;  %v553_v24 = vrot.slane %v512_v16, %v1392_v18 }
 0x1d7   :  { %v605_v25 = vmax.f32 %v545_v21, 0.0  ;;  %v661_v26 = vmul.f32 %v635_v7, %v603_v22  ;;  %v662_v33 = vmul.f32 %v1445_v62, %v604_v2 }
 0x1d8   :  { %v560_v28 = vrot.slane %v546_v23, %v1392_v18  ;;  %v561_v29 = vcombine.high %v553_v24, %v553_v24  ;;  %v606_v30 = vmax.f32 %v553_v24, 0.0  ;;  %v516_v36 = vpop.f32.mrb[4].mxu0 }
 0x1d9   :  { %v663_v35 = vmul.f32 %v636_v15, %v605_v25  ;;  %v518_v40 = vpop.f32.mrb[5].mxu0  ;;  %v688_v41 = vcombine.low %v660_v32, %v661_v26  ;;  %v517_v43 = vadd.f32 %v516_v36, %v427_v27 }
 0x1da   :  { %v562_v37 = vcombine.high %v560_v28, %v560_v28  ;;  %v607_v38 = vmax.f32 %v561_v29, 0.0  ;;  %v608_v39 = vmax.f32 %v560_v28, 0.0  ;;  %v664_v45 = vmul.f32 %v644_v19, %v606_v30 }
 0x1db   :  { %v689_v42 = vcombine.low %v662_v33, %v663_v35  ;;  %v563_v47 = vcombine.high %v517_v43, %v517_v43  ;;  %v570_v48 = vrot.slane %v517_v43, %v1392_v18  ;;  %v696_v0 = vrot.slane %v688_v41, %v1392_v18  ;;  %v896_v41 = vld [vmem:[#allocation11] ss:$0 sm:$0xff] }
 0x1dc   :  { %v609_v44 = vmax.f32 %v562_v37, 0.0  ;;  %v665_v3 = vmul.f32 %v652_v31, %v607_v38  ;;  %v666_v46 = vmul.f32 %v651_v1, %v608_v39  ;;  %v521_v49 = vpop.f32.mrb[6].mxu0 }
 0x1dd   :  { %v703_v50 = vrot.slane %v689_v42, %v1392_v18  ;;  %v522_v52 = vadd.f32 %v521_v49, %v419_v9  ;;  %v523_v53 = vpop.f32.mrb[7].mxu0  ;;  %v577_v54 = vrot.slane %v563_v47, %v1392_v18  ;;  %v578_v55 = vcombine.high %v570_v48, %v570_v48 }
 0x1de   :  { %v705_v51 = vcombine.low %v664_v45, %v665_v3  ;;  %v667_v34 = vmul.f32 %v627_v58, %v609_v44  ;;  %v610_v56 = vmax.f32 %v570_v48, 0.0  ;;  %v719_v59 = vrot.slane %v666_v46, %v1392_v18 }
 0x1df   :  { %v586_v60 = vrot.slane %v522_v52, %v1392_v18  ;;  %v579_v61 = vcombine.high %v577_v54, %v577_v54  ;;  %v611_v8 = vmax.f32 %v578_v55, 0.0  ;;  %v612_v63 = vmax.f32 %v577_v54, 0.0 }
 0x1e0   :  { %v712_v57 = vrot.slane %v705_v51, %v1392_v18  ;;  %v668_v4 = vmul.f32 %v635_v7, %v610_v56  ;;  %v704_v5 = vcombine.low %v696_v0, %v703_v50 }
 0x1e1   :  { %v587_v9 = vcombine.high %v586_v60, %v586_v60  ;;  %v614_v58 = vmax.f32 %v586_v60, 0.0  ;;  %v613_v10 = vmax.f32 %v579_v61, 0.0  ;;  %v669_v11 = vmul.f32 %v1445_v62, %v611_v8 }
 0x1e2   :  { %v720_v6 = vcombine.low %v712_v57, %v719_v59  ;;  %v670_v12 = vmul.f32 %v636_v15, %v612_v63  ;;  %v721_v13 = vcombine.low %v667_v34, %v668_v4 }
 0x1e3   :  { %v615_v14 = vmax.f32 %v587_v9, 0.0  ;;  %v672_v16 = vmul.f32 %v652_v31, %v614_v58  ;;  %v671_v21 = vmul.f32 %v644_v19, %v613_v10 }
 0x1e4   :  { %v758_v20 = vsel %vm131_vm2, %v720_v6, -inf  ;;  %v722_v17 = vcombine.low %v669_v11, %v670_v12  ;;  %v729_v23 = vrot.slane %v721_v13, %v1392_v18 }
 0x1e5   :  { %v759_v22 = vmax.f32 %v704_v5, %v758_v20  ;;  %v673_v2 = vmul.f32 %v651_v1, %v615_v14  ;;  %v738_v24 = vcombine.low %v671_v21, %v672_v16 }
 0x1e6   :  { %v736_v7 = vrot.slane %v722_v17, %v1392_v18 }
 0x1e7   :  { %v760_v25 = vrot.slane %v759_v22, 4  ;;  %v752_v26 = vrot.slane %v673_v2, %v1392_v18  ;;  %v745_v62 = vrot.slane %v738_v24, %v1392_v18 }
 0x1e8   :  { %v737_v27 = vcombine.low %v729_v23, %v736_v7 }
 0x1e9   :  { %v761_v15 = vmax.f32 %v759_v22, %v760_v25  ;;  %v753_v28 = vcombine.low %v745_v62, %v752_v26 }
 0x1eb   :  { %v766_v29 = vsel %vm131_vm2, %v753_v28, -inf  ;;  %v762_v30 = vrot.slane %v761_v15, 2 }
 0x1ec   :  { %v767_v19 = vmax.f32 %v737_v27, %v766_v29 }
 0x1ed   :  { %v763_v32 = vmax.f32 %v761_v15, %v762_v30 }
 0x1ee   :  { %v768_v31 = vrot.slane %v767_v19, 4 }
 0x1ef   :  { %v764_v35 = vrot.slane %v763_v32, 1 }
 0x1f0   :  { %v769_v1 = vmax.f32 %v767_v19, %v768_v31 }
 0x1f1   :  { %v765_v38 = vmax.f32 %v763_v32, %v764_v35 }
 0x1f2   :  { %v770_v33 = vrot.slane %v769_v1, 2 }
 0x1f4   :  { %v771_v36 = vmax.f32 %v769_v1, %v770_v33 }
 0x1f6   :  { %v772_v37 = vrot.slane %v771_v36, 1 }
 0x1f8   :  { %v773_v39 = vmax.f32 %v771_v36, %v772_v37 }
 0x1fa   :  { %v800_v40 = vsel %vm799_vm8, %v773_v39, %v765_v38 }
 0x1fb   :  { %947 = vmatmul.mubr.f32.vlgmr.msra.gmra.mrb[0].mxu1 %v800_v40 }
 0x2ce   :  { %v868_v18 = vpop.f32.mrb[0].mxu1 }
 0x2cf   :  { %v869_v42 = vadd.f32 %v896_v41, %v868_v18  ;;  %v948_v43 = vpop.f32.mrb[1].mxu1 }
 0x2d1   :  { %872 = vst [vmem:[#allocation13] sm:$0x3] %v869_v42 }
 0x2d2   :  { %1164 = shalt.err (!%p1161_p10)
}
 0x2d3   :  { %s1165_s27 = scalar_lea.hbm %s1490_s6, 32 }
 0x2d4   :  { %p1166_p11 = scmp.ne.s32.totalorder %s1490_s6, %s1165_s27  ;;  %p1169_p12 = scmp.lt.u32.totalorder %s1165_s27, %s1490_s6 }
 0x2d6   :  { %p1171_p13 = pnand %p1169_p12, %p1166_p11 }
 0x2d8   :  { %1174 = shalt.err (!%p1171_p13)
}
 0x2d9   :  { %882 = dma.vmem_to_hbm [thread:$0]  %s880_s21, 32, %s1490_s6, [#allocation4]  }
 0x2da   :  { %1183 = dma.done.wait [#allocation4], 32  }
 0x2db   :  { %1184 = vsyncadd [#allocation4], 4294967264 }
 0x2dc   :  { %886 = vsyncpa [#allocation3], 1 }
 0x2dd   :  { %887 = vsyncpa [#allocation6], 1 }
 0x2de   :  { %888 = vsyncpa [#allocation9], 1 }
 0x2df   :  { %889 = vsyncpa [#allocation12], 1 }
 0x2e0   :  { %890 = vsyncpa [#allocation4], 1 }

</bundles_post_ra>
